<compile_context>
chip_gen: v5e
topology: v5e:2x2
jax: 0.10.0
libtpu: 0.0.40
codegen_flags: <defaults>
</compile_context>

<pallas_src>
import functools

import jax
import jax.numpy as jnp
from jax import lax
from jax.experimental import pallas as pl
from jax.experimental.pallas import tpu as pltpu


def _self_attention_kernel(x_ref, wqkv_ref, bqkv_ref, wc_ref, bc_ref,
                           g_ref, beta_ref, o_ref, w_ref,
                           *, batch_per_step, seq_len, channels, num_heads, eps):
    """One grid step == batch_per_step batch elements, tokens flattened on rows.

    x_ref   : (BP*T, C)   pre-attention tokens (residual source)
    wqkv_ref: (C, 3C)     fused Q|K|V weights, (in,out), 1/sqrt(D) folded into Q cols
    bqkv_ref: (1, 3C)     fused Q|K|V bias, scale folded into Q part
    wc_ref  : (C, C)      folded (out_proj o proj) weight, (in,out)
    bc_ref  : (1, C)      folded bias: out_proj_bias @ proj_W.T + proj_bias
    g_ref   : (1, C)      LayerNorm weight,  beta_ref:(1,C) LayerNorm bias
    o_ref   : (BP*T, C)   normalized output tokens
    w_ref   : (BP, T, T)  head-averaged attention weights (exact softmax)
    """
    BP, T, C, H = batch_per_step, seq_len, channels, num_heads
    D = C // H

    x = x_ref[...]                                               # (BP*T, C) f32

    # Fused Q/K/V projection over the whole slab (scale pre-folded into Q).
    qkv = jnp.dot(x, wqkv_ref[...], preferred_element_type=jnp.float32)
    qkv = qkv + bqkv_ref[...]                                    # (BP*T, 3C)
    q = qkv[:, 0 * C:1 * C]
    k = qkv[:, 1 * C:2 * C]
    v = qkv[:, 2 * C:3 * C]

    wc = wc_ref[...]                                             # (C, C)
    bc = bc_ref[...]                                             # (1, C)
    gamma = g_ref[...]
    beta = beta_ref[...]
    inv_h = 1.0 / float(H)

    for b in range(BP):                          # static, unrolled (BP <= 2)
        r0 = b * T
        attn_sum = jnp.zeros((T, T), jnp.float32)
        proj = jnp.zeros((T, C), jnp.float32)    # accumulated ctx @ Wc, in registers
        for h in range(H):                       # static, unrolled (H small)
            c0 = h * D
            qh = q[r0:r0 + T, c0:c0 + D]         # (T, D) static lane slices
            kh = k[r0:r0 + T, c0:c0 + D]
            vh = v[r0:r0 + T, c0:c0 + D]
            # scores = qh @ kh.T (contract over D), f32 accumulation on the MXU.
            s = lax.dot_general(qh, kh, (((1,), (1,)), ((), ())),
                                preferred_element_type=jnp.float32)      # (T, T)
            s_max = jnp.max(s, axis=-1, keepdims=True)
            p = jnp.exp(s - s_max)
            denom = jnp.sum(p, axis=-1, keepdims=True)
            attn = p / denom                      # exact softmax (rows sum to 1)
            attn_sum = attn_sum + attn
            # P @ V in f32 (no bf16 casts), then fold the combined projection in:
            # ctx @ Wc == sum_h ctx_h @ Wc[h*D:(h+1)*D, :]  -- context never hits VMEM.
            ctx_h = jnp.dot(attn, vh, preferred_element_type=jnp.float32)   # (T, D)
            proj = proj + jnp.dot(ctx_h, wc[c0:c0 + D, :],
                                  preferred_element_type=jnp.float32)       # (T, C)
        w_ref[b] = (attn_sum * inv_h).astype(w_ref.dtype)        # head-averaged

        # Residual + LayerNorm for this batch slab.
        z = proj + bc + x[r0:r0 + T, :]
        mu = jnp.mean(z, axis=-1, keepdims=True)
        zc = z - mu
        var = jnp.mean(zc * zc, axis=-1, keepdims=True)
        y = zc * lax.rsqrt(var + eps)                            # EUP rsqrt
        y = y * gamma + beta
        o_ref[r0:r0 + T, :] = y.astype(o_ref.dtype)


def _multi_tensorcore():
    """True only on chips where a 'parallel' grid axis actually maps to >1 TensorCore
    (v7x has 2 TCs/chip; v4/v5p megacore). On single-TC v5e/v6e the grid is a serial
    loop, so splitting the batch only adds per-step overhead."""
    try:
        kind = jax.devices()[0].device_kind.lower().replace(" ", "").replace("-", "")
    except Exception:
        return False
    return any(tag in kind for tag in ("v7", "tpu7", "v4", "v5p"))


def self_attention_layer(x, params, *, num_heads, eps=1e-5):
    """x: (B, C, T) exactly like the PyTorch module. Returns (out (B,C,T), weights (B,T,T))."""
    B, C, T = x.shape
    H = num_heads
    D = C // H
    scale = float(D) ** -0.5

    # ---- host-side parameter prep (glue only) ----
    w_in = params['in_proj_weight']                   # (3C, C), PyTorch (out, in)
    b_in = params['in_proj_bias']                     # (3C,)
    wqkv_t = jnp.concatenate(
        [w_in[0 * C:1 * C].T * scale,                 # fold 1/sqrt(D) into Q
         w_in[1 * C:2 * C].T,
         w_in[2 * C:3 * C].T], axis=1)                # (C, 3C)
    bqkv = jnp.concatenate(
        [b_in[0 * C:1 * C] * scale, b_in[1 * C:2 * C], b_in[2 * C:3 * C]]
    ).reshape(1, 3 * C)

    # Fold MultiheadAttention.out_proj and the extra proj Linear into one affine map:
    #   ((ctx @ Wo.T + bo) @ Wp.T + bp) == ctx @ (Wo.T @ Wp.T) + (bo @ Wp.T + bp)
    wo_t = params['out_proj_weight'].T                # (C, C) (in, out)
    wp_t = params['proj_weight'].T
    wc = wo_t @ wp_t                                  # (C, C)
    bc = (params['out_proj_bias'] @ wp_t + params['proj_bias']).reshape(1, C)

    gamma = params['ln_weight'].reshape(1, C)
    beta = params['ln_bias'].reshape(1, C)

    # torch .view(N, T, C) is a flat reinterpret -> plain reshape here.
    x2d = x.reshape(B * T, C)

    # 2-way batch split only where it buys TensorCore parallelism (v7x / megacore).
    nsplit = 2 if (_multi_tensorcore() and B >= 2 and B % 2 == 0) else 1
    bp_step = B // nsplit

    kernel = functools.partial(
        _self_attention_kernel,
        batch_per_step=bp_step, seq_len=T, channels=C, num_heads=H, eps=float(eps))

    def full(shape):
        return pl.BlockSpec(shape, lambda i, _n=len(shape): (0,) * _n)

    out2d, weights = pl.pallas_call(
        kernel,
        out_shape=(jax.ShapeDtypeStruct((B * T, C), x.dtype),
                   jax.ShapeDtypeStruct((B, T, T), jnp.float32)),
        grid_spec=pltpu.PrefetchScalarGridSpec(
            num_scalar_prefetch=0,
            grid=(nsplit,),
            in_specs=[
                pl.BlockSpec((bp_step * T, C), lambda i: (i, 0)),   # tokens
                full((C, 3 * C)), full((1, 3 * C)),                 # fused QKV
                full((C, C)), full((1, C)),                         # folded out_proj o proj
                full((1, C)), full((1, C)),                         # LayerNorm
            ],
            out_specs=[
                pl.BlockSpec((bp_step * T, C), lambda i: (i, 0)),
                pl.BlockSpec((bp_step, T, T), lambda i: (i, 0, 0)),
            ],
        ),
        compiler_params=pltpu.CompilerParams(
            dimension_semantics=("parallel",)),
    )(x2d, wqkv_t, bqkv, wc, bc, gamma, beta)

    # (T,N,C) -permute-> (N,T,C) -reshape-> (N,C,T) is a flat reinterpret of tokens.
    out = out2d.reshape(B, C, T)
    return out, weights


def self_attention_layer_ref(x, params, *, num_heads, eps=1e-5):
    """Pure-JAX f32 reference mirroring the PyTorch forward (eval mode, mask=None)."""
    B, C, T = x.shape
    H = num_heads
    D = C // H
    scale = float(D) ** -0.5
    xt = x.reshape(B, T, C).astype(jnp.float32)        # torch .view(N, T, C)
    w_in = params['in_proj_weight']
    b_in = params['in_proj_bias']
    q = xt @ w_in[0 * C:1 * C].T + b_in[0 * C:1 * C]
    k = xt @ w_in[1 * C:2 * C].T + b_in[1 * C:2 * C]
    v = xt @ w_in[2 * C:3 * C].T + b_in[2 * C:3 * C]
    qh = q.reshape(B, T, H, D).transpose(0, 2, 1, 3) * scale
    kh = k.reshape(B, T, H, D).transpose(0, 2, 1, 3)
    vh = v.reshape(B, T, H, D).transpose(0, 2, 1, 3)
    attn = jax.nn.softmax(jnp.einsum('bhqd,bhkd->bhqk', qh, kh), axis=-1)
    ctx = jnp.einsum('bhqk,bhkd->bhqd', attn, vh)
    ctx = ctx.transpose(0, 2, 1, 3).reshape(B, T, C)
    a = ctx @ params['out_proj_weight'].T + params['out_proj_bias']
    p = a @ params['proj_weight'].T + params['proj_bias']
    z = p + xt
    mu = z.mean(-1, keepdims=True)
    var = ((z - mu) ** 2).mean(-1, keepdims=True)
    y = (z - mu) / jnp.sqrt(var + eps) * params['ln_weight'] + params['ln_bias']
    return y.reshape(B, C, T).astype(x.dtype), attn.mean(axis=1)


if __name__ == "__main__":
    # Module input is (N, C, T): batch=2, embed_dim=32, time=8; num_heads=4 -> head_dim=8.
    B, C, T = 2, 32, 8
    H = 4

    key = jax.random.PRNGKey(0)
    keys = jax.random.split(key, 9)
    x = jax.random.normal(keys[0], (B, C, T), dtype=jnp.float32)
    params = {
        'in_proj_weight':  jax.random.normal(keys[1], (3 * C, C), jnp.float32) * (C ** -0.5),
        'in_proj_bias':    jax.random.normal(keys[2], (3 * C,), jnp.float32) * 0.1,
        'out_proj_weight': jax.random.normal(keys[3], (C, C), jnp.float32) * (C ** -0.5),
        'out_proj_bias':   jax.random.normal(keys[4], (C,), jnp.float32) * 0.1,
        'proj_weight':     jax.random.normal(keys[5], (C, C), jnp.float32) * (C ** -0.5),
        'proj_bias':       jax.random.normal(keys[6], (C,), jnp.float32) * 0.1,
        'ln_weight':       1.0 + 0.1 * jax.random.normal(keys[7], (C,), jnp.float32),
        'ln_bias':         0.1 * jax.random.normal(keys[8], (C,), jnp.float32),
    }

    out, attn_w = self_attention_layer(x, params, num_heads=H)
    out = jax.block_until_ready(out)
    attn_w = jax.block_until_ready(attn_w)

    ref_out, ref_w = self_attention_layer_ref(x, params, num_heads=H)

    assert out.shape == (B, C, T) and attn_w.shape == (B, T, T)
    # Remaining differences come only from default MXU operand truncation (present in
    # both kernel and reference) plus the host-side weight folding's different
    # associativity; tighter than the previous bf16/approx-reciprocal version.
    assert jnp.allclose(out, ref_out, atol=2e-2, rtol=2e-2), \
        f"output max abs err {jnp.max(jnp.abs(out - ref_out))}"
    assert jnp.allclose(attn_w, ref_w, atol=1e-2, rtol=1e-2), \
        f"weights max abs err {jnp.max(jnp.abs(attn_w - ref_w))}"

    print("KERNEL_OK")
</pallas_src>

<mosaic_0001>
module attributes {stable_mosaic.version = 11 : i64} {
  func.func @_self_attention_kernel(%arg0: i32, %arg1: memref<16x32xf32, #tpu.memory_space<vmem>>, %arg2: memref<32x96xf32, #tpu.memory_space<vmem>>, %arg3: memref<1x96xf32, #tpu.memory_space<vmem>>, %arg4: memref<32x32xf32, #tpu.memory_space<vmem>>, %arg5: memref<1x32xf32, #tpu.memory_space<vmem>>, %arg6: memref<1x32xf32, #tpu.memory_space<vmem>>, %arg7: memref<1x32xf32, #tpu.memory_space<vmem>>, %arg8: memref<16x32xf32, #tpu.memory_space<vmem>>, %arg9: memref<2x8x8xf32, #tpu.memory_space<vmem>>) attributes {dimension_semantics = [#tpu.dimension_semantics<parallel>], iteration_bounds = array<i64: 1>, scalar_prefetch = 0 : i64, scratch_operands = 0 : i64, tpu.core_type = #tpu.core_type<tc>, window_params = [{transform_indices = @transform_0, window_bounds = array<i64: 16, 32>}, {pipeline_mode = #tpu.pipeline_mode<synchronous>, transform_indices = @transform_1, window_bounds = array<i64: 32, 96>}, {pipeline_mode = #tpu.pipeline_mode<synchronous>, transform_indices = @transform_2, window_bounds = array<i64: 1, 96>}, {pipeline_mode = #tpu.pipeline_mode<synchronous>, transform_indices = @transform_3, window_bounds = array<i64: 32, 32>}, {pipeline_mode = #tpu.pipeline_mode<synchronous>, transform_indices = @transform_4, window_bounds = array<i64: 1, 32>}, {pipeline_mode = #tpu.pipeline_mode<synchronous>, transform_indices = @transform_5, window_bounds = array<i64: 1, 32>}, {pipeline_mode = #tpu.pipeline_mode<synchronous>, transform_indices = @transform_6, window_bounds = array<i64: 1, 32>}, {transform_indices = @transform_7, window_bounds = array<i64: 16, 32>}, {transform_indices = @transform_8, window_bounds = array<i64: 2, 8, 8>}]} {
    %c0 = arith.constant 0 : index
    %c0_0 = arith.constant 0 : index
    %0 = vector.load %arg1[%c0, %c0_0] : memref<16x32xf32, #tpu.memory_space<vmem>>, vector<16x32xf32>
    %c0_1 = arith.constant 0 : index
    %c0_2 = arith.constant 0 : index
    %1 = vector.load %arg2[%c0_1, %c0_2] : memref<32x96xf32, #tpu.memory_space<vmem>>, vector<32x96xf32>
    %cst = arith.constant dense<0.000000e+00> : vector<16x96xf32>
    %2 = tpu.matmul %0, %1, %cst {dimension_numbers = #tpu.dot_dimension_numbers<[1], [0], [0], [1], [0, 0, 1, 1], [], []>} : vector<16x32xf32>, vector<32x96xf32>, vector<16x96xf32> -> vector<16x96xf32>
    %c0_3 = arith.constant 0 : index
    %c0_4 = arith.constant 0 : index
    %3 = vector.load %arg3[%c0_3, %c0_4] : memref<1x96xf32, #tpu.memory_space<vmem>>, vector<1x96xf32>
    %4 = vector.broadcast %3 : vector<1x96xf32> to vector<16x96xf32>
    %5 = arith.addf %2, %4 : vector<16x96xf32>
    %6 = vector.extract_strided_slice %5 {offsets = [0, 0], sizes = [16, 32], strides = [1, 1]} : vector<16x96xf32> to vector<16x32xf32>
    %7 = vector.extract_strided_slice %5 {offsets = [0, 32], sizes = [16, 32], strides = [1, 1]} : vector<16x96xf32> to vector<16x32xf32>
    %8 = vector.extract_strided_slice %5 {offsets = [0, 64], sizes = [16, 32], strides = [1, 1]} : vector<16x96xf32> to vector<16x32xf32>
    %c0_5 = arith.constant 0 : index
    %c0_6 = arith.constant 0 : index
    %9 = vector.load %arg4[%c0_5, %c0_6] : memref<32x32xf32, #tpu.memory_space<vmem>>, vector<32x32xf32>
    %c0_7 = arith.constant 0 : index
    %c0_8 = arith.constant 0 : index
    %10 = vector.load %arg5[%c0_7, %c0_8] : memref<1x32xf32, #tpu.memory_space<vmem>>, vector<1x32xf32>
    %c0_9 = arith.constant 0 : index
    %c0_10 = arith.constant 0 : index
    %11 = vector.load %arg6[%c0_9, %c0_10] : memref<1x32xf32, #tpu.memory_space<vmem>>, vector<1x32xf32>
    %c0_11 = arith.constant 0 : index
    %c0_12 = arith.constant 0 : index
    %12 = vector.load %arg7[%c0_11, %c0_12] : memref<1x32xf32, #tpu.memory_space<vmem>>, vector<1x32xf32>
    %cst_13 = arith.constant 0.000000e+00 : f32
    %13 = vector.broadcast %cst_13 : f32 to vector<8x8xf32>
    %cst_14 = arith.constant 0.000000e+00 : f32
    %14 = vector.broadcast %cst_14 : f32 to vector<8x32xf32>
    %15 = vector.extract_strided_slice %6 {offsets = [0, 0], sizes = [8, 8], strides = [1, 1]} : vector<16x32xf32> to vector<8x8xf32>
    %16 = vector.extract_strided_slice %7 {offsets = [0, 0], sizes = [8, 8], strides = [1, 1]} : vector<16x32xf32> to vector<8x8xf32>
    %17 = vector.extract_strided_slice %8 {offsets = [0, 0], sizes = [8, 8], strides = [1, 1]} : vector<16x32xf32> to vector<8x8xf32>
    %cst_15 = arith.constant dense<0.000000e+00> : vector<8x8xf32>
    %18 = tpu.matmul %15, %16, %cst_15 {dimension_numbers = #tpu.dot_dimension_numbers<[1], [1], [0], [0], [0, 0, 1, 0], [], []>} : vector<8x8xf32>, vector<8x8xf32>, vector<8x8xf32> -> vector<8x8xf32>
    %cst_16 = arith.constant dense<0xFF800000> : vector<8xf32>
    %19 = vector.multi_reduction <maximumf>, %18, %cst_16 [1] : vector<8x8xf32> to vector<8xf32>
    %20 = vector.shape_cast %19 : vector<8xf32> to vector<8x1xf32>
    %21 = vector.broadcast %20 : vector<8x1xf32> to vector<8x8xf32>
    %22 = arith.subf %18, %21 : vector<8x8xf32>
    %23 = math.exp %22 : vector<8x8xf32>
    %cst_17 = arith.constant dense<0.000000e+00> : vector<8xf32>
    %24 = vector.multi_reduction <add>, %23, %cst_17 [1] : vector<8x8xf32> to vector<8xf32>
    %25 = vector.shape_cast %24 : vector<8xf32> to vector<8x1xf32>
    %26 = vector.broadcast %25 : vector<8x1xf32> to vector<8x8xf32>
    %27 = arith.divf %23, %26 : vector<8x8xf32>
    %28 = arith.addf %13, %27 : vector<8x8xf32>
    %cst_18 = arith.constant dense<0.000000e+00> : vector<8x8xf32>
    %29 = tpu.matmul %27, %17, %cst_18 {dimension_numbers = #tpu.dot_dimension_numbers<[1], [0], [0], [1], [0, 0, 1, 1], [], []>} : vector<8x8xf32>, vector<8x8xf32>, vector<8x8xf32> -> vector<8x8xf32>
    %30 = vector.extract_strided_slice %9 {offsets = [0, 0], sizes = [8, 32], strides = [1, 1]} : vector<32x32xf32> to vector<8x32xf32>
    %cst_19 = arith.constant dense<0.000000e+00> : vector<8x32xf32>
    %31 = tpu.matmul %29, %30, %cst_19 {dimension_numbers = #tpu.dot_dimension_numbers<[1], [0], [0], [1], [0, 0, 1, 1], [], []>} : vector<8x8xf32>, vector<8x32xf32>, vector<8x32xf32> -> vector<8x32xf32>
    %32 = arith.addf %14, %31 : vector<8x32xf32>
    %33 = vector.extract_strided_slice %6 {offsets = [0, 8], sizes = [8, 8], strides = [1, 1]} : vector<16x32xf32> to vector<8x8xf32>
    %34 = vector.extract_strided_slice %7 {offsets = [0, 8], sizes = [8, 8], strides = [1, 1]} : vector<16x32xf32> to vector<8x8xf32>
    %35 = vector.extract_strided_slice %8 {offsets = [0, 8], sizes = [8, 8], strides = [1, 1]} : vector<16x32xf32> to vector<8x8xf32>
    %cst_20 = arith.constant dense<0.000000e+00> : vector<8x8xf32>
    %36 = tpu.matmul %33, %34, %cst_20 {dimension_numbers = #tpu.dot_dimension_numbers<[1], [1], [0], [0], [0, 0, 1, 0], [], []>} : vector<8x8xf32>, vector<8x8xf32>, vector<8x8xf32> -> vector<8x8xf32>
    %cst_21 = arith.constant dense<0xFF800000> : vector<8xf32>
    %37 = vector.multi_reduction <maximumf>, %36, %cst_21 [1] : vector<8x8xf32> to vector<8xf32>
    %38 = vector.shape_cast %37 : vector<8xf32> to vector<8x1xf32>
    %39 = vector.broadcast %38 : vector<8x1xf32> to vector<8x8xf32>
    %40 = arith.subf %36, %39 : vector<8x8xf32>
    %41 = math.exp %40 : vector<8x8xf32>
    %cst_22 = arith.constant dense<0.000000e+00> : vector<8xf32>
    %42 = vector.multi_reduction <add>, %41, %cst_22 [1] : vector<8x8xf32> to vector<8xf32>
    %43 = vector.shape_cast %42 : vector<8xf32> to vector<8x1xf32>
    %44 = vector.broadcast %43 : vector<8x1xf32> to vector<8x8xf32>
    %45 = arith.divf %41, %44 : vector<8x8xf32>
    %46 = arith.addf %28, %45 : vector<8x8xf32>
    %cst_23 = arith.constant dense<0.000000e+00> : vector<8x8xf32>
    %47 = tpu.matmul %45, %35, %cst_23 {dimension_numbers = #tpu.dot_dimension_numbers<[1], [0], [0], [1], [0, 0, 1, 1], [], []>} : vector<8x8xf32>, vector<8x8xf32>, vector<8x8xf32> -> vector<8x8xf32>
    %48 = vector.extract_strided_slice %9 {offsets = [8, 0], sizes = [8, 32], strides = [1, 1]} : vector<32x32xf32> to vector<8x32xf32>
    %cst_24 = arith.constant dense<0.000000e+00> : vector<8x32xf32>
    %49 = tpu.matmul %47, %48, %cst_24 {dimension_numbers = #tpu.dot_dimension_numbers<[1], [0], [0], [1], [0, 0, 1, 1], [], []>} : vector<8x8xf32>, vector<8x32xf32>, vector<8x32xf32> -> vector<8x32xf32>
    %50 = arith.addf %32, %49 : vector<8x32xf32>
    %51 = vector.extract_strided_slice %6 {offsets = [0, 16], sizes = [8, 8], strides = [1, 1]} : vector<16x32xf32> to vector<8x8xf32>
    %52 = vector.extract_strided_slice %7 {offsets = [0, 16], sizes = [8, 8], strides = [1, 1]} : vector<16x32xf32> to vector<8x8xf32>
    %53 = vector.extract_strided_slice %8 {offsets = [0, 16], sizes = [8, 8], strides = [1, 1]} : vector<16x32xf32> to vector<8x8xf32>
    %cst_25 = arith.constant dense<0.000000e+00> : vector<8x8xf32>
    %54 = tpu.matmul %51, %52, %cst_25 {dimension_numbers = #tpu.dot_dimension_numbers<[1], [1], [0], [0], [0, 0, 1, 0], [], []>} : vector<8x8xf32>, vector<8x8xf32>, vector<8x8xf32> -> vector<8x8xf32>
    %cst_26 = arith.constant dense<0xFF800000> : vector<8xf32>
    %55 = vector.multi_reduction <maximumf>, %54, %cst_26 [1] : vector<8x8xf32> to vector<8xf32>
    %56 = vector.shape_cast %55 : vector<8xf32> to vector<8x1xf32>
    %57 = vector.broadcast %56 : vector<8x1xf32> to vector<8x8xf32>
    %58 = arith.subf %54, %57 : vector<8x8xf32>
    %59 = math.exp %58 : vector<8x8xf32>
    %cst_27 = arith.constant dense<0.000000e+00> : vector<8xf32>
    %60 = vector.multi_reduction <add>, %59, %cst_27 [1] : vector<8x8xf32> to vector<8xf32>
    %61 = vector.shape_cast %60 : vector<8xf32> to vector<8x1xf32>
    %62 = vector.broadcast %61 : vector<8x1xf32> to vector<8x8xf32>
    %63 = arith.divf %59, %62 : vector<8x8xf32>
    %64 = arith.addf %46, %63 : vector<8x8xf32>
    %cst_28 = arith.constant dense<0.000000e+00> : vector<8x8xf32>
    %65 = tpu.matmul %63, %53, %cst_28 {dimension_numbers = #tpu.dot_dimension_numbers<[1], [0], [0], [1], [0, 0, 1, 1], [], []>} : vector<8x8xf32>, vector<8x8xf32>, vector<8x8xf32> -> vector<8x8xf32>
    %66 = vector.extract_strided_slice %9 {offsets = [16, 0], sizes = [8, 32], strides = [1, 1]} : vector<32x32xf32> to vector<8x32xf32>
    %cst_29 = arith.constant dense<0.000000e+00> : vector<8x32xf32>
    %67 = tpu.matmul %65, %66, %cst_29 {dimension_numbers = #tpu.dot_dimension_numbers<[1], [0], [0], [1], [0, 0, 1, 1], [], []>} : vector<8x8xf32>, vector<8x32xf32>, vector<8x32xf32> -> vector<8x32xf32>
    %68 = arith.addf %50, %67 : vector<8x32xf32>
    %69 = vector.extract_strided_slice %6 {offsets = [0, 24], sizes = [8, 8], strides = [1, 1]} : vector<16x32xf32> to vector<8x8xf32>
    %70 = vector.extract_strided_slice %7 {offsets = [0, 24], sizes = [8, 8], strides = [1, 1]} : vector<16x32xf32> to vector<8x8xf32>
    %71 = vector.extract_strided_slice %8 {offsets = [0, 24], sizes = [8, 8], strides = [1, 1]} : vector<16x32xf32> to vector<8x8xf32>
    %cst_30 = arith.constant dense<0.000000e+00> : vector<8x8xf32>
    %72 = tpu.matmul %69, %70, %cst_30 {dimension_numbers = #tpu.dot_dimension_numbers<[1], [1], [0], [0], [0, 0, 1, 0], [], []>} : vector<8x8xf32>, vector<8x8xf32>, vector<8x8xf32> -> vector<8x8xf32>
    %cst_31 = arith.constant dense<0xFF800000> : vector<8xf32>
    %73 = vector.multi_reduction <maximumf>, %72, %cst_31 [1] : vector<8x8xf32> to vector<8xf32>
    %74 = vector.shape_cast %73 : vector<8xf32> to vector<8x1xf32>
    %75 = vector.broadcast %74 : vector<8x1xf32> to vector<8x8xf32>
    %76 = arith.subf %72, %75 : vector<8x8xf32>
    %77 = math.exp %76 : vector<8x8xf32>
    %cst_32 = arith.constant dense<0.000000e+00> : vector<8xf32>
    %78 = vector.multi_reduction <add>, %77, %cst_32 [1] : vector<8x8xf32> to vector<8xf32>
    %79 = vector.shape_cast %78 : vector<8xf32> to vector<8x1xf32>
    %80 = vector.broadcast %79 : vector<8x1xf32> to vector<8x8xf32>
    %81 = arith.divf %77, %80 : vector<8x8xf32>
    %82 = arith.addf %64, %81 : vector<8x8xf32>
    %cst_33 = arith.constant dense<0.000000e+00> : vector<8x8xf32>
    %83 = tpu.matmul %81, %71, %cst_33 {dimension_numbers = #tpu.dot_dimension_numbers<[1], [0], [0], [1], [0, 0, 1, 1], [], []>} : vector<8x8xf32>, vector<8x8xf32>, vector<8x8xf32> -> vector<8x8xf32>
    %84 = vector.extract_strided_slice %9 {offsets = [24, 0], sizes = [8, 32], strides = [1, 1]} : vector<32x32xf32> to vector<8x32xf32>
    %cst_34 = arith.constant dense<0.000000e+00> : vector<8x32xf32>
    %85 = tpu.matmul %83, %84, %cst_34 {dimension_numbers = #tpu.dot_dimension_numbers<[1], [0], [0], [1], [0, 0, 1, 1], [], []>} : vector<8x8xf32>, vector<8x32xf32>, vector<8x32xf32> -> vector<8x32xf32>
    %86 = arith.addf %68, %85 : vector<8x32xf32>
    %cst_35 = arith.constant 2.500000e-01 : f32
    %87 = vector.broadcast %cst_35 : f32 to vector<8x8xf32>
    %88 = arith.mulf %82, %87 : vector<8x8xf32>
    %c0_36 = arith.constant 0 : index
    %c0_37 = arith.constant 0 : index
    %c0_38 = arith.constant 0 : index
    %89 = vector.load %arg9[%c0_36, %c0_37, %c0_38] : memref<2x8x8xf32, #tpu.memory_space<vmem>>, vector<1x8x8xf32>
    %90 = vector.shape_cast %89 : vector<1x8x8xf32> to vector<8x8xf32>
    %91 = vector.shape_cast %88 : vector<8x8xf32> to vector<1x8x8xf32>
    tpu.vector_store %arg9[%c0_36, %c0_37, %c0_38], %91 {strides = array<i32>} : memref<2x8x8xf32, #tpu.memory_space<vmem>>, vector<1x8x8xf32>,
    %92 = vector.broadcast %10 : vector<1x32xf32> to vector<8x32xf32>
    %93 = arith.addf %86, %92 : vector<8x32xf32>
    %94 = vector.extract_strided_slice %0 {offsets = [0, 0], sizes = [8, 32], strides = [1, 1]} : vector<16x32xf32> to vector<8x32xf32>
    %95 = arith.addf %93, %94 : vector<8x32xf32>
    %cst_39 = arith.constant dense<0.000000e+00> : vector<8xf32>
    %96 = vector.multi_reduction <add>, %95, %cst_39 [1] : vector<8x32xf32> to vector<8xf32>
    %97 = vector.shape_cast %96 : vector<8xf32> to vector<8x1xf32>
    %cst_40 = arith.constant 3.200000e+01 : f32
    %98 = vector.broadcast %cst_40 : f32 to vector<8x1xf32>
    %99 = arith.divf %97, %98 : vector<8x1xf32>
    %100 = vector.broadcast %99 : vector<8x1xf32> to vector<8x32xf32>
    %101 = arith.subf %95, %100 : vector<8x32xf32>
    %102 = arith.mulf %101, %101 : vector<8x32xf32>
    %cst_41 = arith.constant dense<0.000000e+00> : vector<8xf32>
    %103 = vector.multi_reduction <add>, %102, %cst_41 [1] : vector<8x32xf32> to vector<8xf32>
    %104 = vector.shape_cast %103 : vector<8xf32> to vector<8x1xf32>
    %cst_42 = arith.constant 3.200000e+01 : f32
    %105 = vector.broadcast %cst_42 : f32 to vector<8x1xf32>
    %106 = arith.divf %104, %105 : vector<8x1xf32>
    %cst_43 = arith.constant 9.99999974E-6 : f32
    %107 = vector.broadcast %cst_43 : f32 to vector<8x1xf32>
    %108 = arith.addf %106, %107 : vector<8x1xf32>
    %109 = math.rsqrt %108 : vector<8x1xf32>
    %110 = vector.broadcast %109 : vector<8x1xf32> to vector<8x32xf32>
    %111 = arith.mulf %101, %110 : vector<8x32xf32>
    %112 = vector.broadcast %11 : vector<1x32xf32> to vector<8x32xf32>
    %113 = arith.mulf %111, %112 : vector<8x32xf32>
    %114 = vector.broadcast %12 : vector<1x32xf32> to vector<8x32xf32>
    %115 = arith.addf %113, %114 : vector<8x32xf32>
    %c0_44 = arith.constant 0 : index
    %c0_45 = arith.constant 0 : index
    %116 = vector.load %arg8[%c0_44, %c0_45] : memref<16x32xf32, #tpu.memory_space<vmem>>, vector<8x32xf32>
    tpu.vector_store %arg8[%c0_44, %c0_45], %115 {strides = array<i32>} : memref<16x32xf32, #tpu.memory_space<vmem>>, vector<8x32xf32>,
    %cst_46 = arith.constant 0.000000e+00 : f32
    %117 = vector.broadcast %cst_46 : f32 to vector<8x8xf32>
    %cst_47 = arith.constant 0.000000e+00 : f32
    %118 = vector.broadcast %cst_47 : f32 to vector<8x32xf32>
    %119 = vector.extract_strided_slice %6 {offsets = [8, 0], sizes = [8, 8], strides = [1, 1]} : vector<16x32xf32> to vector<8x8xf32>
    %120 = vector.extract_strided_slice %7 {offsets = [8, 0], sizes = [8, 8], strides = [1, 1]} : vector<16x32xf32> to vector<8x8xf32>
    %121 = vector.extract_strided_slice %8 {offsets = [8, 0], sizes = [8, 8], strides = [1, 1]} : vector<16x32xf32> to vector<8x8xf32>
    %cst_48 = arith.constant dense<0.000000e+00> : vector<8x8xf32>
    %122 = tpu.matmul %119, %120, %cst_48 {dimension_numbers = #tpu.dot_dimension_numbers<[1], [1], [0], [0], [0, 0, 1, 0], [], []>} : vector<8x8xf32>, vector<8x8xf32>, vector<8x8xf32> -> vector<8x8xf32>
    %cst_49 = arith.constant dense<0xFF800000> : vector<8xf32>
    %123 = vector.multi_reduction <maximumf>, %122, %cst_49 [1] : vector<8x8xf32> to vector<8xf32>
    %124 = vector.shape_cast %123 : vector<8xf32> to vector<8x1xf32>
    %125 = vector.broadcast %124 : vector<8x1xf32> to vector<8x8xf32>
    %126 = arith.subf %122, %125 : vector<8x8xf32>
    %127 = math.exp %126 : vector<8x8xf32>
    %cst_50 = arith.constant dense<0.000000e+00> : vector<8xf32>
    %128 = vector.multi_reduction <add>, %127, %cst_50 [1] : vector<8x8xf32> to vector<8xf32>
    %129 = vector.shape_cast %128 : vector<8xf32> to vector<8x1xf32>
    %130 = vector.broadcast %129 : vector<8x1xf32> to vector<8x8xf32>
    %131 = arith.divf %127, %130 : vector<8x8xf32>
    %132 = arith.addf %117, %131 : vector<8x8xf32>
    %cst_51 = arith.constant dense<0.000000e+00> : vector<8x8xf32>
    %133 = tpu.matmul %131, %121, %cst_51 {dimension_numbers = #tpu.dot_dimension_numbers<[1], [0], [0], [1], [0, 0, 1, 1], [], []>} : vector<8x8xf32>, vector<8x8xf32>, vector<8x8xf32> -> vector<8x8xf32>
    %134 = vector.extract_strided_slice %9 {offsets = [0, 0], sizes = [8, 32], strides = [1, 1]} : vector<32x32xf32> to vector<8x32xf32>
    %cst_52 = arith.constant dense<0.000000e+00> : vector<8x32xf32>
    %135 = tpu.matmul %133, %134, %cst_52 {dimension_numbers = #tpu.dot_dimension_numbers<[1], [0], [0], [1], [0, 0, 1, 1], [], []>} : vector<8x8xf32>, vector<8x32xf32>, vector<8x32xf32> -> vector<8x32xf32>
    %136 = arith.addf %118, %135 : vector<8x32xf32>
    %137 = vector.extract_strided_slice %6 {offsets = [8, 8], sizes = [8, 8], strides = [1, 1]} : vector<16x32xf32> to vector<8x8xf32>
    %138 = vector.extract_strided_slice %7 {offsets = [8, 8], sizes = [8, 8], strides = [1, 1]} : vector<16x32xf32> to vector<8x8xf32>
    %139 = vector.extract_strided_slice %8 {offsets = [8, 8], sizes = [8, 8], strides = [1, 1]} : vector<16x32xf32> to vector<8x8xf32>
    %cst_53 = arith.constant dense<0.000000e+00> : vector<8x8xf32>
    %140 = tpu.matmul %137, %138, %cst_53 {dimension_numbers = #tpu.dot_dimension_numbers<[1], [1], [0], [0], [0, 0, 1, 0], [], []>} : vector<8x8xf32>, vector<8x8xf32>, vector<8x8xf32> -> vector<8x8xf32>
    %cst_54 = arith.constant dense<0xFF800000> : vector<8xf32>
    %141 = vector.multi_reduction <maximumf>, %140, %cst_54 [1] : vector<8x8xf32> to vector<8xf32>
    %142 = vector.shape_cast %141 : vector<8xf32> to vector<8x1xf32>
    %143 = vector.broadcast %142 : vector<8x1xf32> to vector<8x8xf32>
    %144 = arith.subf %140, %143 : vector<8x8xf32>
    %145 = math.exp %144 : vector<8x8xf32>
    %cst_55 = arith.constant dense<0.000000e+00> : vector<8xf32>
    %146 = vector.multi_reduction <add>, %145, %cst_55 [1] : vector<8x8xf32> to vector<8xf32>
    %147 = vector.shape_cast %146 : vector<8xf32> to vector<8x1xf32>
    %148 = vector.broadcast %147 : vector<8x1xf32> to vector<8x8xf32>
    %149 = arith.divf %145, %148 : vector<8x8xf32>
    %150 = arith.addf %132, %149 : vector<8x8xf32>
    %cst_56 = arith.constant dense<0.000000e+00> : vector<8x8xf32>
    %151 = tpu.matmul %149, %139, %cst_56 {dimension_numbers = #tpu.dot_dimension_numbers<[1], [0], [0], [1], [0, 0, 1, 1], [], []>} : vector<8x8xf32>, vector<8x8xf32>, vector<8x8xf32> -> vector<8x8xf32>
    %152 = vector.extract_strided_slice %9 {offsets = [8, 0], sizes = [8, 32], strides = [1, 1]} : vector<32x32xf32> to vector<8x32xf32>
    %cst_57 = arith.constant dense<0.000000e+00> : vector<8x32xf32>
    %153 = tpu.matmul %151, %152, %cst_57 {dimension_numbers = #tpu.dot_dimension_numbers<[1], [0], [0], [1], [0, 0, 1, 1], [], []>} : vector<8x8xf32>, vector<8x32xf32>, vector<8x32xf32> -> vector<8x32xf32>
    %154 = arith.addf %136, %153 : vector<8x32xf32>
    %155 = vector.extract_strided_slice %6 {offsets = [8, 16], sizes = [8, 8], strides = [1, 1]} : vector<16x32xf32> to vector<8x8xf32>
    %156 = vector.extract_strided_slice %7 {offsets = [8, 16], sizes = [8, 8], strides = [1, 1]} : vector<16x32xf32> to vector<8x8xf32>
    %157 = vector.extract_strided_slice %8 {offsets = [8, 16], sizes = [8, 8], strides = [1, 1]} : vector<16x32xf32> to vector<8x8xf32>
    %cst_58 = arith.constant dense<0.000000e+00> : vector<8x8xf32>
    %158 = tpu.matmul %155, %156, %cst_58 {dimension_numbers = #tpu.dot_dimension_numbers<[1], [1], [0], [0], [0, 0, 1, 0], [], []>} : vector<8x8xf32>, vector<8x8xf32>, vector<8x8xf32> -> vector<8x8xf32>
    %cst_59 = arith.constant dense<0xFF800000> : vector<8xf32>
    %159 = vector.multi_reduction <maximumf>, %158, %cst_59 [1] : vector<8x8xf32> to vector<8xf32>
    %160 = vector.shape_cast %159 : vector<8xf32> to vector<8x1xf32>
    %161 = vector.broadcast %160 : vector<8x1xf32> to vector<8x8xf32>
    %162 = arith.subf %158, %161 : vector<8x8xf32>
    %163 = math.exp %162 : vector<8x8xf32>
    %cst_60 = arith.constant dense<0.000000e+00> : vector<8xf32>
    %164 = vector.multi_reduction <add>, %163, %cst_60 [1] : vector<8x8xf32> to vector<8xf32>
    %165 = vector.shape_cast %164 : vector<8xf32> to vector<8x1xf32>
    %166 = vector.broadcast %165 : vector<8x1xf32> to vector<8x8xf32>
    %167 = arith.divf %163, %166 : vector<8x8xf32>
    %168 = arith.addf %150, %167 : vector<8x8xf32>
    %cst_61 = arith.constant dense<0.000000e+00> : vector<8x8xf32>
    %169 = tpu.matmul %167, %157, %cst_61 {dimension_numbers = #tpu.dot_dimension_numbers<[1], [0], [0], [1], [0, 0, 1, 1], [], []>} : vector<8x8xf32>, vector<8x8xf32>, vector<8x8xf32> -> vector<8x8xf32>
    %170 = vector.extract_strided_slice %9 {offsets = [16, 0], sizes = [8, 32], strides = [1, 1]} : vector<32x32xf32> to vector<8x32xf32>
    %cst_62 = arith.constant dense<0.000000e+00> : vector<8x32xf32>
    %171 = tpu.matmul %169, %170, %cst_62 {dimension_numbers = #tpu.dot_dimension_numbers<[1], [0], [0], [1], [0, 0, 1, 1], [], []>} : vector<8x8xf32>, vector<8x32xf32>, vector<8x32xf32> -> vector<8x32xf32>
    %172 = arith.addf %154, %171 : vector<8x32xf32>
    %173 = vector.extract_strided_slice %6 {offsets = [8, 24], sizes = [8, 8], strides = [1, 1]} : vector<16x32xf32> to vector<8x8xf32>
    %174 = vector.extract_strided_slice %7 {offsets = [8, 24], sizes = [8, 8], strides = [1, 1]} : vector<16x32xf32> to vector<8x8xf32>
    %175 = vector.extract_strided_slice %8 {offsets = [8, 24], sizes = [8, 8], strides = [1, 1]} : vector<16x32xf32> to vector<8x8xf32>
    %cst_63 = arith.constant dense<0.000000e+00> : vector<8x8xf32>
    %176 = tpu.matmul %173, %174, %cst_63 {dimension_numbers = #tpu.dot_dimension_numbers<[1], [1], [0], [0], [0, 0, 1, 0], [], []>} : vector<8x8xf32>, vector<8x8xf32>, vector<8x8xf32> -> vector<8x8xf32>
    %cst_64 = arith.constant dense<0xFF800000> : vector<8xf32>
    %177 = vector.multi_reduction <maximumf>, %176, %cst_64 [1] : vector<8x8xf32> to vector<8xf32>
    %178 = vector.shape_cast %177 : vector<8xf32> to vector<8x1xf32>
    %179 = vector.broadcast %178 : vector<8x1xf32> to vector<8x8xf32>
    %180 = arith.subf %176, %179 : vector<8x8xf32>
    %181 = math.exp %180 : vector<8x8xf32>
    %cst_65 = arith.constant dense<0.000000e+00> : vector<8xf32>
    %182 = vector.multi_reduction <add>, %181, %cst_65 [1] : vector<8x8xf32> to vector<8xf32>
    %183 = vector.shape_cast %182 : vector<8xf32> to vector<8x1xf32>
    %184 = vector.broadcast %183 : vector<8x1xf32> to vector<8x8xf32>
    %185 = arith.divf %181, %184 : vector<8x8xf32>
    %186 = arith.addf %168, %185 : vector<8x8xf32>
    %cst_66 = arith.constant dense<0.000000e+00> : vector<8x8xf32>
    %187 = tpu.matmul %185, %175, %cst_66 {dimension_numbers = #tpu.dot_dimension_numbers<[1], [0], [0], [1], [0, 0, 1, 1], [], []>} : vector<8x8xf32>, vector<8x8xf32>, vector<8x8xf32> -> vector<8x8xf32>
    %188 = vector.extract_strided_slice %9 {offsets = [24, 0], sizes = [8, 32], strides = [1, 1]} : vector<32x32xf32> to vector<8x32xf32>
    %cst_67 = arith.constant dense<0.000000e+00> : vector<8x32xf32>
    %189 = tpu.matmul %187, %188, %cst_67 {dimension_numbers = #tpu.dot_dimension_numbers<[1], [0], [0], [1], [0, 0, 1, 1], [], []>} : vector<8x8xf32>, vector<8x32xf32>, vector<8x32xf32> -> vector<8x32xf32>
    %190 = arith.addf %172, %189 : vector<8x32xf32>
    %cst_68 = arith.constant 2.500000e-01 : f32
    %191 = vector.broadcast %cst_68 : f32 to vector<8x8xf32>
    %192 = arith.mulf %186, %191 : vector<8x8xf32>
    %c1 = arith.constant 1 : index
    %c0_69 = arith.constant 0 : index
    %c0_70 = arith.constant 0 : index
    %193 = vector.load %arg9[%c1, %c0_69, %c0_70] : memref<2x8x8xf32, #tpu.memory_space<vmem>>, vector<1x8x8xf32>
    %194 = vector.shape_cast %193 : vector<1x8x8xf32> to vector<8x8xf32>
    %195 = vector.shape_cast %192 : vector<8x8xf32> to vector<1x8x8xf32>
    tpu.vector_store %arg9[%c1, %c0_69, %c0_70], %195 {strides = array<i32>} : memref<2x8x8xf32, #tpu.memory_space<vmem>>, vector<1x8x8xf32>,
    %196 = vector.broadcast %10 : vector<1x32xf32> to vector<8x32xf32>
    %197 = arith.addf %190, %196 : vector<8x32xf32>
    %198 = vector.extract_strided_slice %0 {offsets = [8, 0], sizes = [8, 32], strides = [1, 1]} : vector<16x32xf32> to vector<8x32xf32>
    %199 = arith.addf %197, %198 : vector<8x32xf32>
    %cst_71 = arith.constant dense<0.000000e+00> : vector<8xf32>
    %200 = vector.multi_reduction <add>, %199, %cst_71 [1] : vector<8x32xf32> to vector<8xf32>
    %201 = vector.shape_cast %200 : vector<8xf32> to vector<8x1xf32>
    %cst_72 = arith.constant 3.200000e+01 : f32
    %202 = vector.broadcast %cst_72 : f32 to vector<8x1xf32>
    %203 = arith.divf %201, %202 : vector<8x1xf32>
    %204 = vector.broadcast %203 : vector<8x1xf32> to vector<8x32xf32>
    %205 = arith.subf %199, %204 : vector<8x32xf32>
    %206 = arith.mulf %205, %205 : vector<8x32xf32>
    %cst_73 = arith.constant dense<0.000000e+00> : vector<8xf32>
    %207 = vector.multi_reduction <add>, %206, %cst_73 [1] : vector<8x32xf32> to vector<8xf32>
    %208 = vector.shape_cast %207 : vector<8xf32> to vector<8x1xf32>
    %cst_74 = arith.constant 3.200000e+01 : f32
    %209 = vector.broadcast %cst_74 : f32 to vector<8x1xf32>
    %210 = arith.divf %208, %209 : vector<8x1xf32>
    %cst_75 = arith.constant 9.99999974E-6 : f32
    %211 = vector.broadcast %cst_75 : f32 to vector<8x1xf32>
    %212 = arith.addf %210, %211 : vector<8x1xf32>
    %213 = math.rsqrt %212 : vector<8x1xf32>
    %214 = vector.broadcast %213 : vector<8x1xf32> to vector<8x32xf32>
    %215 = arith.mulf %205, %214 : vector<8x32xf32>
    %216 = vector.broadcast %11 : vector<1x32xf32> to vector<8x32xf32>
    %217 = arith.mulf %215, %216 : vector<8x32xf32>
    %218 = vector.broadcast %12 : vector<1x32xf32> to vector<8x32xf32>
    %219 = arith.addf %217, %218 : vector<8x32xf32>
    %c8 = arith.constant 8 : index
    %c0_76 = arith.constant 0 : index
    %220 = vector.load %arg8[%c8, %c0_76] : memref<16x32xf32, #tpu.memory_space<vmem>>, vector<8x32xf32>
    tpu.vector_store %arg8[%c8, %c0_76], %219 {strides = array<i32>} : memref<16x32xf32, #tpu.memory_space<vmem>>, vector<8x32xf32>,
    return
  }
  func.func @transform_0(%arg0: i32) -> (i32, i32) {
    %c0_i32 = arith.constant 0 : i32
    %c0_i32_0 = arith.constant 0 : i32
    return %arg0, %c0_i32 : i32, i32
  }
  func.func @transform_1(%arg0: i32) -> (i32, i32) {
    %c0_i32 = arith.constant 0 : i32
    %c0_i32_0 = arith.constant 0 : i32
    %c0_i32_1 = arith.constant 0 : i32
    return %c0_i32, %c0_i32_0 : i32, i32
  }
  func.func @transform_2(%arg0: i32) -> (i32, i32) {
    %c0_i32 = arith.constant 0 : i32
    %c0_i32_0 = arith.constant 0 : i32
    %c0_i32_1 = arith.constant 0 : i32
    return %c0_i32, %c0_i32_0 : i32, i32
  }
  func.func @transform_3(%arg0: i32) -> (i32, i32) {
    %c0_i32 = arith.constant 0 : i32
    %c0_i32_0 = arith.constant 0 : i32
    %c0_i32_1 = arith.constant 0 : i32
    return %c0_i32, %c0_i32_0 : i32, i32
  }
  func.func @transform_4(%arg0: i32) -> (i32, i32) {
    %c0_i32 = arith.constant 0 : i32
    %c0_i32_0 = arith.constant 0 : i32
    %c0_i32_1 = arith.constant 0 : i32
    return %c0_i32, %c0_i32_0 : i32, i32
  }
  func.func @transform_5(%arg0: i32) -> (i32, i32) {
    %c0_i32 = arith.constant 0 : i32
    %c0_i32_0 = arith.constant 0 : i32
    %c0_i32_1 = arith.constant 0 : i32
    return %c0_i32, %c0_i32_0 : i32, i32
  }
  func.func @transform_6(%arg0: i32) -> (i32, i32) {
    %c0_i32 = arith.constant 0 : i32
    %c0_i32_0 = arith.constant 0 : i32
    %c0_i32_1 = arith.constant 0 : i32
    return %c0_i32, %c0_i32_0 : i32, i32
  }
  func.func @transform_7(%arg0: i32) -> (i32, i32) {
    %c0_i32 = arith.constant 0 : i32
    %c0_i32_0 = arith.constant 0 : i32
    return %arg0, %c0_i32 : i32, i32
  }
  func.func @transform_8(%arg0: i32) -> (i32, i32, i32) {
    %c0_i32 = arith.constant 0 : i32
    %c0_i32_0 = arith.constant 0 : i32
    %c0_i32_1 = arith.constant 0 : i32
    return %arg0, %c0_i32, %c0_i32_0 : i32, i32, i32
  }
}

</mosaic_0001>

<bundles_post_ra>
// kernel: tpu_custom_call.1
= control target key start
LH: loop header
LB: loop body
LE: loop exit
PB: predicated region body
PF: predicated region fallthrough
CT: control target
= control target key end

     0   :  { %14 = vsyncpa [#allocation3], 0  ;;  %s1540_s0 = inlined_call_operand.hbm [shape: f32[16,32], index: 0, kind: input, shape index: {}]   ;;  %s1541_s1 = inlined_call_operand.hbm [shape: f32[32,96], index: 1, kind: input, shape index: {}]   ;;  %s1542_s2 = inlined_call_operand.vmem [shape: f32[1,96], index: 2, kind: input, shape index: {}]   ;;  %s1543_s3 = inlined_call_operand.hbm [shape: f32[32,32], index: 3, kind: input, shape index: {}]   ;;  %s1544_s4 = inlined_call_operand.vmem [shape: f32[1,32], index: 4, kind: input, shape index: {}]   ;;  %s1545_s5 = inlined_call_operand.vmem [shape: f32[1,32], index: 5, kind: input, shape index: {}]   ;;  %s1546_s6 = inlined_call_operand.vmem [shape: f32[1,32], index: 6, kind: input, shape index: {}]   ;;  %s1547_s7 = inlined_call_operand.hbm [shape: f32[16,32], index: 7, kind: output, shape index: {0}]   ;;  %s1548_s8 = inlined_call_operand.hbm [shape: f32[2,8,8], index: 8, kind: output, shape index: {1}]  }
   0x1   :  { %15 = vsyncpa [#allocation6], 0 }
   0x2   :  { %16 = vsyncpa [#allocation4], 0 }
   0x3   :  { %17 = vsyncpa [#allocation10], 0  ;;  %s35_s29 = sshll.u32 %s1541_s1, 4  ;;  %s1279_s30 = smov [#allocation5]   ;;  %s36_s29 = int_to_ptr.hbm [resolvable:$true] %s35_s29 }
   0x4   :  { %s37_s9 = sshll.u32 %s1279_s30, 4  ;;  %s22_s12 = sshll.u32 %s1540_s0, 4  ;;  %s38_s9 = int_to_ptr.vmem [resolvable:$true] %s37_s9  ;;  %s23_s12 = int_to_ptr.hbm [resolvable:$true] %s22_s12 }
   0x5   :  { %s1280_s13 = smov 128   ;;  %s1281_s14 = smov 8  }
   0x6   :  { %43 = dma.hbm_to_vmem [thread:$0]  %s36_s29, 512, %s38_s9, [#allocation6], %s1280_s13, %s1280_s13, %s1281_s14  }
   0x7   :  { %s1282_s15 = smov [#allocation2]   ;;  %s50_s1 = sshll.u32 %s1543_s3, 4  ;;  %s51_s1 = int_to_ptr.hbm [resolvable:$true] %s50_s1 }
   0x8   :  { %s24_s16 = sshll.u32 %s1282_s15, 4  ;;  %s1283_s0 = smov [#allocation7]   ;;  %s25_s16 = int_to_ptr.vmem [resolvable:$true] %s24_s16 }
   0x9   :  { %30 = dma.hbm_to_vmem [thread:$0]  %s23_s12, 256, %s25_s16, [#allocation3], %s1280_s13, %s1280_s13, %s1281_s14  }
   0xa   :  { %s52_s19 = sshll.u32 %s1283_s0, 4  ;;  %s53_s19 = int_to_ptr.vmem [resolvable:$true] %s52_s19 }
   0xb   :  { %58 = dma.hbm_to_vmem [thread:$0]  %s51_s1, 512, %s53_s19, [#allocation6], %s1280_s13, %s1280_s13, %s1281_s14  }
   0xc   :  { %1271 = dma.done.wait [#allocation3], 256  }
   0xd   :  { %1272 = vsyncadd [#allocation3], 4294967040 }
   0xe   :  { %1273 = dma.done.wait [#allocation6], 1024  }
   0xf   :  { %1274 = vsyncadd [#allocation6], 4294966272  ;;  %v82_v0 = vld [vmem:[#allocation5 + $0x18] sm:$0xff]  ;;  %v81_v1 = vld [vmem:[#allocation5 + $0x10] sm:$0xff]  ;;  %vm87_vm0 = vcmask 261120   ;;  %s1284_s21 = smov 120  }
  0x10   :  { %106 = vmatpush.msra.mxu0 %v82_v0  ;;  %v80_v2 = vld [vmem:[#allocation5 + $0x8] sm:$0xff]  ;;  %v79_v3 = vld [vmem:[#allocation5] sm:$0xff]  ;;  %v1361_v4 = vld [vmem:[#allocation2] sm:$0xff]  ;;  %s1285_s22 = smov 96   ;;  %s1286_s23 = smov 88   ;;  %vm127_vm1 = vcmask 64512  }
  0x11   :  { %v1109_v5 = vld [vmem:[%s1542_s2] ss:$0 sm:$0xff]  ;;  %v1375_v8 = vld [vmem:[#allocation2 + $0x8] sm:$0xff]  ;;  %s1287_s2 = smov 112   ;;  %s1288_s24 = smov 72   ;;  %v117_v59 = vld [vmem:[#allocation7] sm:$0xff] }
  0x12   :  { %107 = vmatpush.msra.mxu0 %v81_v1  ;;  %s1289_s25 = smov 64   ;;  %s1290_s26 = smov 56   ;;  %v118_v60 = vld [vmem:[#allocation7 + $0x8] sm:$0xff] }
  0x13   :  { %s1291_s27 = smov 80   ;;  %s1292_s28 = smov 48  }
  0x14   :  { %108 = vmatpush.msra.mxu0 %v80_v2  ;;  %s1293_s29 = smov 104   ;;  %s1294_s30 = smov 40  }
  0x15   :  { %s1037_s18 = sshll.u32 %s1548_s8, 4  ;;  %s1297_s8 = smov [#allocation8]   ;;  %s1038_s18 = int_to_ptr.hbm [resolvable:$true] %s1037_s18 }
  0x16   :  { %109 = vmatpush.msra.mxu0 %v79_v3  ;;  %s1022_s1 = sshll.u32 %s1297_s8, 4  ;;  %s1024_s3 = sshll.u32 %s1547_s7, 4  ;;  %s1023_s1 = int_to_ptr.vmem [resolvable:$true] %s1022_s1  ;;  %s1025_s3 = int_to_ptr.hbm [resolvable:$true] %s1024_s3 }
  0x17   :  { %1056 = vmatmul.msk.f32.vlgmr.msra.gmra.mxu0 %vm87_vm0, %v1361_v4 }
  0x1f   :  { %1057 = vmatmul.msk.f32.gmra.mxu0 %vm87_vm0, %v1375_v8 }
  0x94   :  { %v111_v6 = vpop.f32.mrf.mxu0 }
  0x95   :  { %v1368_v7 = vadd.f32 %v1109_v5, %v111_v6 }
  0x97   :  { %203 = vrot.lane.b32.xlu1 %v1368_v7, %s1284_s21  ;;  %125 = vrot.lane.b32.xlu0 %v1368_v7, %s1285_s22 }
  0x9c   :  { %v114_v16 = vpop.f32.mrf.mxu0 }
  0x9d   :  { %v1388_v17 = vadd.f32 %v1109_v5, %v114_v16 }
  0x9f   :  { %205 = vrot.lane.b32.xlu0 %v1368_v7, %s1286_s23 }
 0x109   :  { %v126_v9 = vpop.permute.xlu0 %125  ;;  %v204_v11 = vpop.permute.xlu1 %203 }
 0x10a   :  { %1058 = vmatpush.xpose.msk.msra.mxu1 %vm127_vm1, %v126_v9 }
 0x10d   :  { %1059 = vmatmul.msk.f32.vlgmr.msra.gmra.mxu1 %vm127_vm1, %v1368_v7 }
 0x10e   :  { %300 = vmatpush.msrb.mxu1 %v118_v60 }
 0x111   :  { %v206_v10 = vpop.permute.xlu0 %205 }
 0x112   :  { %1061 = vmatpush.xpose.msk.msra.mxu3 %vm127_vm1, %v206_v10 }
 0x115   :  { %1062 = vmatmul.msk.f32.vlgmr.msra.gmra.mxu3 %vm127_vm1, %v204_v11 }
 0x116   :  { %323 = vmatpush.msrb.mxu3 %v117_v59 }
 0x18a   :  { %v149_v12 = vpop.f32.mrf.mxu1 }
 0x18b   :  { %v152_v13 = vsel %vm127_vm1, %v149_v12, -inf }
 0x18c   :  { %153 = vmax.xlane.f32.xlu1 %v152_v13 }
 0x198   :  { %v228_v14 = vpop.f32.mrf.mxu3 }
 0x199   :  { %v231_v15 = vsel %vm127_vm1, %v228_v14, -inf }
 0x19a   :  { %232 = vmax.xlane.f32.xlu2 %v231_v15 }
 0x1a5   :  { %328 = vrot.lane.b32.xlu1 %v1368_v7, %s1287_s2 }
 0x1ad   :  { %580 = vrot.lane.b32.xlu1 %v1388_v17, %s1285_s22 }
 0x1b5   :  { %433 = vrot.lane.b32.xlu1 %v1368_v7, %s1288_s24 }
 0x1ff   :  { %v154_v18 = vpop.xlane.xlu1 %153 }
 0x200   :  { %v155_v19 = vsub.f32 %v149_v12, %v154_v18 }
 0x202   :  { %v156_v20 = vmul.f32 1.442695, %v155_v19 }
 0x204   :  { %1113 = vpow2.f32 %v156_v20 }
 0x20a   :  { %v1114_v21 = vpop.eup %1113 }
 0x20b   :  { %v158_v22 = vsel %vm127_vm1, %v1114_v21, 0.0 }
 0x20c   :  { %159 = vadd.xlane.f32.xlu2 %v158_v22 }
 0x20d   :  { %v233_v23 = vpop.xlane.xlu2 %232 }
 0x20e   :  { %v234_v24 = vsub.f32 %v228_v14, %v233_v23 }
 0x210   :  { %v235_v25 = vmul.f32 1.442695, %v234_v24 }
 0x212   :  { %1115 = vpow2.f32 %v235_v25 }
 0x217   :  { %v329_v26 = vpop.permute.xlu1 %328 }
 0x218   :  { %v1116_v27 = vpop.eup %1115 }
 0x219   :  { %v237_v28 = vsel %vm127_vm1, %v1116_v27, 0.0 }
 0x21a   :  { %238 = vadd.xlane.f32.xlu0 %v237_v28 }
 0x21f   :  { %v1395_v29 = vpop.permute.xlu1 %580 }
 0x224   :  { %177 = vrot.lane.b32.xlu2 %v1368_v7, %s1289_s25 }
 0x227   :  { %v434_v30 = vpop.permute.xlu1 %433 }
 0x228   :  { %1070 = vmatpush.xpose.msk.msrb.mxu0 %vm127_vm1, %v434_v30 }
 0x22c   :  { %256 = vrot.lane.b32.xlu2 %v1368_v7, %s1290_s26 }
 0x234   :  { %330 = vrot.lane.b32.xlu2 %v1368_v7, %s1291_s27 }
 0x27f   :  { %v160_v31 = vpop.xlane.xlu2 %159 }
 0x280   :  { %1117 = vrcp.f32 %v160_v31  ;;  %v172_v36 = vand.u32 2147483648, %v160_v31  ;;  %v170_v38 = vand.u32 2147483647, %v160_v31  ;;  %vm166_vm3 = vweird.f32 %v160_v31 }
 0x282   :  { %v173_v41 = vor.u32 1.1754944e-38, %v172_v36  ;;  %vm171_vm5 = vcmp.eq.f32.partialorder %v170_v38, 8.507059e+37 }
 0x286   :  { %v1118_v32 = vpop.eup %1117 }
 0x287   :  { %v162_v33 = vmul.f32 %v1118_v32, %v160_v31  ;;  %v178_v34 = vpop.permute.xlu2 %177  ;;  %vm167_vm2 = vweird.f32 %v1118_v32 }
 0x288   :  { %198 = vmatpush.msra.mxu2 %v178_v34  ;;  %vm168_vm4 = vmor %vm166_vm3, %vm167_vm2 }
 0x289   :  { %v163_v35 = vsub.f32 1.0, %v162_v33 }
 0x28b   :  { %v164_v37 = vmul.f32 %v1118_v32, %v163_v35 }
 0x28d   :  { %v239_v39 = vpop.xlane.xlu0 %238  ;;  %v165_v40 = vadd.f32 %v1118_v32, %v164_v37 }
 0x28e   :  { %1119 = vrcp.f32 %v239_v39  ;;  %v251_v50 = vand.u32 2147483648, %v239_v39  ;;  %v249_v52 = vand.u32 2147483647, %v239_v39  ;;  %vm245_vm7 = vweird.f32 %v239_v39 }
 0x28f   :  { %v257_v42 = vpop.permute.xlu2 %256  ;;  %v169_v43 = vsel %vm168_vm4, %v1118_v32, %v165_v40 }
 0x290   :  { %277 = vmatpush.msrb.mxu2 %v257_v42  ;;  %v174_v44 = vsel %vm171_vm5, %v173_v41, %v169_v43  ;;  %v252_v54 = vor.u32 1.1754944e-38, %v251_v50  ;;  %vm250_vm9 = vcmp.eq.f32.partialorder %v249_v52, 8.507059e+37 }
 0x291   :  { %v175_v45 = vmul.f32 %v1114_v21, %v174_v44 }
 0x293   :  { %1060 = vmatmul.msk.f32.vlgmr.msra.gmra.mxu2 %vm127_vm1, %v175_v45 }
 0x294   :  { %v1120_v46 = vpop.eup %1119 }
 0x295   :  { %v241_v47 = vmul.f32 %v1120_v46, %v239_v39  ;;  %vm246_vm6 = vweird.f32 %v1120_v46 }
 0x296   :  { %vm247_vm8 = vmor %vm245_vm7, %vm246_vm6 }
 0x297   :  { %v242_v48 = vsub.f32 1.0, %v241_v47  ;;  %v331_v49 = vpop.permute.xlu2 %330 }
 0x298   :  { %1066 = vmatpush.xpose.msk.msra.mxu2 %vm127_vm1, %v331_v49 }
 0x299   :  { %v243_v51 = vmul.f32 %v1120_v46, %v242_v48 }
 0x29b   :  { %v244_v53 = vadd.f32 %v1120_v46, %v243_v51 }
 0x29d   :  { %v248_v55 = vsel %vm247_vm8, %v1120_v46, %v244_v53 }
 0x29e   :  { %v253_v56 = vsel %vm250_vm9, %v252_v54, %v248_v55 }
 0x29f   :  { %v254_v57 = vmul.f32 %v1116_v27, %v253_v56 }
 0x2a1   :  { %v255_v58 = vadd.f32 %v254_v57, %v175_v45  ;;  %1063 = vmatmul.msk.f32.vlgmr.msrb.gmra.mxu2 %vm127_vm1, %v254_v57 }
 0x2a9   :  { %1067 = vmatmul.msk.f32.vlgmr.msra.gmra.mxu2 %vm127_vm1, %v329_v26  ;;  %v119_v26 = vld [vmem:[#allocation7 + $0x10] sm:$0xff] }
 0x2aa   :  { %425 = vmatpush.msra.mxu3 %v119_v26 }
 0x316   :  { %v200_v61 = vpop.f32.mrf.mxu2 }
 0x317   :  { %1065 = vmatmul.msk.f32.vlgmr.msrb.gmra.mxu3 %vm127_vm1, %v200_v61 }
 0x318   :  { %1074 = vmatpush.xpose.msk.msrb.mxu3 %vm127_vm1, %v1395_v29 }
 0x324   :  { %v279_v62 = vpop.f32.mrf.mxu2 }
 0x325   :  { %1064 = vmatmul.msk.f32.vlgmr.msrb.gmra.mxu1 %vm127_vm1, %v279_v62 }
 0x32c   :  { %v353_v63 = vpop.f32.mrf.mxu2 }
 0x32d   :  { %v356_v0 = vsel %vm127_vm1, %v353_v63, -inf }
 0x32e   :  { %357 = vmax.xlane.f32.xlu2 %v356_v0 }
 0x346   :  { %631 = vrot.lane.b32.xlu2 %v1388_v17, %s1289_s25 }
 0x39a   :  { %v1430_v32 = vpop.f32.mrf.mxu3 }
 0x3a1   :  { %v358_v1 = vpop.xlane.xlu2 %357 }
 0x3a2   :  { %v359_v2 = vsub.f32 %v353_v63, %v358_v1  ;;  %v1422_v27 = vpop.f32.mrf.mxu1 }
 0x3a4   :  { %v360_v3 = vmul.f32 1.442695, %v359_v2 }
 0x3a6   :  { %1121 = vpow2.f32 %v360_v3 }
 0x3a9   :  { %v632_v9 = vpop.permute.xlu2 %631 }
 0x3aa   :  { %652 = vmatpush.msra.mxu0 %v632_v9 }
 0x3ac   :  { %v1122_v5 = vpop.eup %1121 }
 0x3ad   :  { %v362_v6 = vsel %vm127_vm1, %v1122_v5, 0.0 }
 0x3ae   :  { %363 = vadd.xlane.f32.xlu0 %v362_v6 }
 0x3c2   :  { %381 = vrot.lane.b32.xlu0 %v1368_v7, %s1292_s28 }
 0x3ca   :  { %431 = vrot.lane.b32.xlu0 %v1368_v7, %s1293_s29 }
 0x421   :  { %v364_v10 = vpop.xlane.xlu0 %363 }
 0x422   :  { %1123 = vrcp.f32 %v364_v10  ;;  %v376_v14 = vand.u32 2147483648, %v364_v10  ;;  %v374_v16 = vand.u32 2147483647, %v364_v10  ;;  %vm370_vm11 = vweird.f32 %v364_v10 }
 0x424   :  { %v377_v19 = vor.u32 1.1754944e-38, %v376_v14  ;;  %vm375_vm13 = vcmp.eq.f32.partialorder %v374_v16, 8.507059e+37 }
 0x428   :  { %v1124_v11 = vpop.eup %1123 }
 0x429   :  { %v366_v12 = vmul.f32 %v1124_v11, %v364_v10  ;;  %vm371_vm10 = vweird.f32 %v1124_v11 }
 0x42a   :  { %vm372_vm12 = vmor %vm370_vm11, %vm371_vm10 }
 0x42b   :  { %v367_v13 = vsub.f32 1.0, %v366_v12 }
 0x42d   :  { %v368_v15 = vmul.f32 %v1124_v11, %v367_v13 }
 0x42f   :  { %v369_v18 = vadd.f32 %v1124_v11, %v368_v15  ;;  %v1460_v15 = vld [vmem:[#allocation7 + $0x18] sm:$0xff] }
 0x431   :  { %v373_v20 = vsel %vm372_vm12, %v1124_v11, %v369_v18 }
 0x432   :  { %v378_v21 = vsel %vm375_vm13, %v377_v19, %v373_v20 }
 0x433   :  { %v379_v22 = vmul.f32 %v1122_v5, %v378_v21 }
 0x434   :  { %v382_v23 = vpop.permute.xlu0 %381 }
 0x435   :  { %402 = vmatpush.msra.mxu1 %v382_v23  ;;  %v380_v24 = vadd.f32 %v379_v22, %v255_v58 }
 0x436   :  { %1068 = vmatmul.msk.f32.vlgmr.msra.gmra.mxu1 %vm127_vm1, %v379_v22 }
 0x437   :  { %528 = vmatpush.msrb.mxu1 %v1460_v15 }
 0x43c   :  { %v432_v25 = vpop.permute.xlu0 %431 }
 0x43d   :  { %1071 = vmatmul.msk.f32.vlgmr.msrb.gmra.mxu0 %vm127_vm1, %v432_v25 }
 0x43e   :  { %777 = vmatpush.msrb.mxu0 %v117_v59 }
 0x4b3   :  { %v404_v28 = vpop.f32.mrf.mxu1 }
 0x4b4   :  { %1069 = vmatmul.msk.f32.vlgmr.msra.gmra.mxu3 %vm127_vm1, %v404_v28 }
 0x4b5   :  { %754 = vmatpush.msra.mxu3 %v118_v60 }
 0x4ba   :  { %v456_v30 = vpop.f32.mrf.mxu0 }
 0x4bb   :  { %v459_v31 = vsel %vm127_vm1, %v456_v30, -inf }
 0x4bc   :  { %1075 = vmatmul.msk.f32.vlgmr.msrb.gmra.mxu3 %vm127_vm1, %v1388_v17  ;;  %460 = vmax.xlane.f32.xlu2 %v459_v31 }
 0x4bd   :  { %879 = vmatpush.msrb.mxu3 %v119_v26 }
 0x4d4   :  { %784 = vrot.lane.b32.xlu2 %v1388_v17, %s1291_s27 }
 0x52f   :  { %v461_v29 = vpop.xlane.xlu2 %460 }
 0x530   :  { %v462_v33 = vsub.f32 %v456_v30, %v461_v29 }
 0x532   :  { %v463_v35 = vmul.f32 1.442695, %v462_v33 }
 0x534   :  { %1125 = vpow2.f32 %v463_v35 }
 0x537   :  { %v1432_v34 = vpop.f32.mrf.mxu3  ;;  %v785_v12 = vpop.permute.xlu2 %784 }
 0x53a   :  { %v1126_v38 = vpop.eup %1125 }
 0x53b   :  { %v465_v39 = vsel %vm127_vm1, %v1126_v38, 0.0 }
 0x53f   :  { %v603_v36 = vpop.f32.mrf.mxu3 }
 0x540   :  { %v606_v37 = vsel %vm127_vm1, %v603_v36, -inf }
 0x541   :  { %607 = vmax.xlane.f32.xlu1 %v606_v37 }
 0x549   :  { %466 = vadd.xlane.f32.xlu1 %v465_v39 }
 0x562   :  { %659 = vrot.lane.b32.xlu1 %v1388_v17, %s1286_s23 }
 0x56a   :  { %887 = vrot.lane.b32.xlu1 %v1388_v17, %s1288_s24 }
 0x5b4   :  { %v608_v40 = vpop.xlane.xlu1 %607 }
 0x5b5   :  { %v609_v41 = vsub.f32 %v603_v36, %v608_v40  ;;  %v326_v40 = vadd.f32 %v1430_v32, %v1422_v27 }
 0x5b7   :  { %v610_v42 = vmul.f32 1.442695, %v609_v41 }
 0x5b9   :  { %1127 = vpow2.f32 %v610_v42  ;;  %v430_v42 = vadd.f32 %v1432_v34, %v326_v40 }
 0x5bc   :  { %v467_v43 = vpop.xlane.xlu1 %466 }
 0x5bd   :  { %1129 = vrcp.f32 %v467_v43  ;;  %v479_v49 = vand.u32 2147483648, %v467_v43  ;;  %v477_v51 = vand.u32 2147483647, %v467_v43  ;;  %vm473_vm15 = vweird.f32 %v467_v43 }
 0x5bf   :  { %v1128_v44 = vpop.eup %1127  ;;  %v480_v53 = vor.u32 1.1754944e-38, %v479_v49  ;;  %vm478_vm3 = vcmp.eq.f32.partialorder %v477_v51, 8.507059e+37 }
 0x5c0   :  { %v612_v45 = vsel %vm127_vm1, %v1128_v44, 0.0 }
 0x5c1   :  { %613 = vadd.xlane.f32.xlu0 %v612_v45 }
 0x5c3   :  { %v1130_v46 = vpop.eup %1129 }
 0x5c4   :  { %v469_v47 = vmul.f32 %v1130_v46, %v467_v43  ;;  %vm474_vm14 = vweird.f32 %v1130_v46 }
 0x5c5   :  { %vm475_vm2 = vmor %vm473_vm15, %vm474_vm14 }
 0x5c6   :  { %v470_v48 = vsub.f32 1.0, %v469_v47 }
 0x5c8   :  { %v471_v50 = vmul.f32 %v1130_v46, %v470_v48 }
 0x5ca   :  { %v472_v52 = vadd.f32 %v1130_v46, %v471_v50 }
 0x5cc   :  { %v476_v54 = vsel %vm475_vm2, %v1130_v46, %v472_v52 }
 0x5cd   :  { %v481_v55 = vsel %vm478_vm3, %v480_v53, %v476_v54 }
 0x5ce   :  { %v482_v56 = vmul.f32 %v1126_v38, %v481_v55 }
 0x5d0   :  { %v483_v57 = vadd.f32 %v482_v56, %v380_v24 }
 0x5d2   :  { %v534_v58 = vmul.f32 0.25, %v483_v57 }
 0x5d4   :  { %535 = vst.msk [vmem:[#allocation9] sm:$0xff] %vm127_vm1, %v534_v58  ;;  %v660_v62 = vpop.permute.xlu1 %659 }
 0x5d5   :  { %484 = vrot.lane.b32.xlu0 %v1368_v7, %s1294_s30 }
 0x5dc   :  { %v888_v11 = vpop.permute.xlu1 %887 }
 0x5dd   :  { %657 = vrot.lane.b32.xlu0 %v1388_v17, %s1284_s21 }
 0x5e5   :  { %782 = vrot.lane.b32.xlu0 %v1388_v17, %s1287_s2 }
 0x5ed   :  { %885 = vrot.lane.b32.xlu0 %v1388_v17, %s1293_s29 }
 0x634   :  { %v614_v59 = vpop.xlane.xlu0 %613 }
 0x635   :  { %1131 = vrcp.f32 %v614_v59  ;;  %v626_v0 = vand.u32 2147483648, %v614_v59  ;;  %v624_v2 = vand.u32 2147483647, %v614_v59  ;;  %vm620_vm5 = vweird.f32 %v614_v59 }
 0x637   :  { %v627_v3 = vor.u32 1.1754944e-38, %v626_v0  ;;  %vm625_vm7 = vcmp.eq.f32.partialorder %v624_v2, 8.507059e+37 }
 0x63b   :  { %v1132_v60 = vpop.eup %1131 }
 0x63c   :  { %v616_v61 = vmul.f32 %v1132_v60, %v614_v59  ;;  %vm621_vm4 = vweird.f32 %v1132_v60 }
 0x63d   :  { %vm622_vm6 = vmor %vm620_vm5, %vm621_vm4 }
 0x63e   :  { %v617_v63 = vsub.f32 1.0, %v616_v61 }
 0x640   :  { %v618_v1 = vmul.f32 %v1132_v60, %v617_v63 }
 0x642   :  { %v619_v7 = vadd.f32 %v1132_v60, %v618_v1 }
 0x644   :  { %v623_v5 = vsel %vm622_vm6, %v1132_v60, %v619_v7 }
 0x645   :  { %v628_v6 = vsel %vm625_vm7, %v627_v3, %v623_v5 }
 0x646   :  { %v1450_v9 = vmul.f32 %v1128_v44, %v628_v6  ;;  %v1483_v44 = vld [vmem:[%s1544_s4] ss:$0 sm:$0xff] }
 0x647   :  { %v485_v10 = vpop.permute.xlu0 %484 }
 0x648   :  { %505 = vmatpush.msrb.mxu2 %v485_v10  ;;  %1076 = vmatmul.msk.f32.vlgmr.msra.gmra.mxu0 %vm127_vm1, %v1450_v9 }
 0x649   :  { %1086 = vmatpush.xpose.msk.msra.mxu0 %vm127_vm1, %v888_v11  ;;  %1072 = vmatmul.msk.f32.vlgmr.msrb.gmra.mxu2 %vm127_vm1, %v482_v56 }
 0x64a   :  { %1077 = vmatpush.xpose.msk.msra.mxu2 %vm127_vm1, %v660_v62 }
 0x64e   :  { %1082 = vmatpush.xpose.msk.msrb.mxu2 %vm127_vm1, %v785_v12 }
 0x64f   :  { %v658_v13 = vpop.permute.xlu0 %657 }
 0x651   :  { %1078 = vmatmul.msk.f32.vlgmr.msra.gmra.mxu2 %vm127_vm1, %v658_v13 }
 0x657   :  { %v783_v14 = vpop.permute.xlu0 %782 }
 0x659   :  { %1083 = vmatmul.msk.f32.vlgmr.msrb.gmra.mxu2 %vm127_vm1, %v783_v14 }
 0x65f   :  { %v886_v19 = vpop.permute.xlu0 %885 }
 0x6c5   :  { %v654_v16 = vpop.f32.mrf.mxu0 }
 0x6c6   :  { %1081 = vmatmul.msk.f32.vlgmr.msrb.gmra.mxu0 %vm127_vm1, %v654_v16 }
 0x6cc   :  { %v507_v18 = vpop.f32.mrf.mxu2 }
 0x6cd   :  { %1073 = vmatmul.msk.f32.vlgmr.msrb.gmra.mxu1 %vm127_vm1, %v507_v18  ;;  %v1295_v18 = vmov 32.0  }
 0x6ce   :  { %1087 = vmatmul.msk.f32.vlgmr.msra.gmra.mxu0 %vm127_vm1, %v886_v19 }
 0x6d4   :  { %v682_v20 = vpop.f32.mrf.mxu2 }
 0x6d5   :  { %v685_v21 = vsel %vm127_vm1, %v682_v20, -inf }
 0x6d6   :  { %686 = vmax.xlane.f32.xlu1 %v685_v21 }
 0x6dc   :  { %v807_v22 = vpop.f32.mrf.mxu2 }
 0x6dd   :  { %v810_v23 = vsel %vm127_vm1, %v807_v22, -inf }
 0x6de   :  { %811 = vmax.xlane.f32.xlu0 %v810_v23 }
 0x743   :  { %v1468_v24 = vpop.f32.mrf.mxu0 }
 0x749   :  { %v687_v25 = vpop.xlane.xlu1 %686 }
 0x74a   :  { %v688_v26 = vsub.f32 %v682_v20, %v687_v25  ;;  %v530_v41 = vpop.f32.mrf.mxu1 }
 0x74b   :  { %v910_v28 = vpop.f32.mrf.mxu0  ;;  %v533_v43 = vadd.f32 %v530_v41, %v430_v42 }
 0x74c   :  { %v689_v30 = vmul.f32 1.442695, %v688_v26  ;;  %v913_v31 = vsel %vm127_vm1, %v910_v28, -inf }
 0x74d   :  { %914 = vmax.xlane.f32.xlu2 %v913_v31  ;;  %v539_v45 = vadd.f32 %v1483_v44, %v533_v43 }
 0x74e   :  { %1133 = vpow2.f32 %v689_v30 }
 0x74f   :  { %v1487_v46 = vadd.f32 %v539_v45, %v1361_v4 }
 0x751   :  { %v812_v29 = vpop.xlane.xlu0 %811  ;;  %v541_v47 = vsel %vm87_vm0, %v1487_v46, 0.0 }
 0x752   :  { %v813_v33 = vsub.f32 %v807_v22, %v812_v29 }
 0x754   :  { %v1134_v35 = vpop.eup %1133  ;;  %v814_v36 = vmul.f32 1.442695, %v813_v33 }
 0x755   :  { %v691_v37 = vsel %vm127_vm1, %v1134_v35, 0.0 }
 0x756   :  { %1135 = vpow2.f32 %v814_v36  ;;  %692 = vadd.xlane.f32.xlu1 %v691_v37 }
 0x75c   :  { %v1136_v38 = vpop.eup %1135 }
 0x75d   :  { %v816_v39 = vsel %vm127_vm1, %v1136_v38, 0.0 }
 0x75e   :  { %817 = vadd.xlane.f32.xlu0 %v816_v39 }
 0x765   :  { %710 = vrot.lane.b32.xlu2 %v1388_v17, %s1290_s26 }
 0x772   :  { %835 = vrot.lane.b32.xlu0 %v1388_v17, %s1292_s28 }
 0x79c   :  { %542 = vadd.xlane.f32.xlu0 %v541_v47 }
 0x7c0   :  { %v915_v48 = vpop.xlane.xlu2 %914 }
 0x7c1   :  { %v916_v27 = vsub.f32 %v910_v28, %v915_v48 }
 0x7c3   :  { %v917_v32 = vmul.f32 1.442695, %v916_v27 }
 0x7c5   :  { %1137 = vpow2.f32 %v917_v32 }
 0x7c8   :  { %v711_v34 = vpop.permute.xlu2 %710 }
 0x7c9   :  { %v693_v49 = vpop.xlane.xlu1 %692  ;;  %731 = vmatpush.msra.mxu1 %v711_v34 }
 0x7ca   :  { %1139 = vrcp.f32 %v693_v49  ;;  %v705_v55 = vand.u32 2147483648, %v693_v49  ;;  %v703_v57 = vand.u32 2147483647, %v693_v49  ;;  %vm699_vm9 = vweird.f32 %v693_v49 }
 0x7cb   :  { %v1491_v50 = vpop.eup %1137 }
 0x7cc   :  { %v919_v51 = vsel %vm127_vm1, %v1491_v50, 0.0  ;;  %v706_v60 = vor.u32 1.1754944e-38, %v705_v55  ;;  %vm704_vm11 = vcmp.eq.f32.partialorder %v703_v57, 8.507059e+37  ;;  %v1112_v57 = vld [vmem:[%s1546_s6] ss:$0 sm:$0xff] }
 0x7cd   :  { %920 = vadd.xlane.f32.xlu1 %v919_v51 }
 0x7d0   :  { %v1140_v4 = vpop.eup %1139 }
 0x7d1   :  { %v695_v52 = vmul.f32 %v1140_v4, %v693_v49  ;;  %v818_v53 = vpop.xlane.xlu0 %817  ;;  %vm700_vm8 = vweird.f32 %v1140_v4 }
 0x7d2   :  { %1141 = vrcp.f32 %v818_v53  ;;  %vm701_vm10 = vmor %vm699_vm9, %vm700_vm8  ;;  %v830_v2 = vand.u32 2147483648, %v818_v53  ;;  %v828_v3 = vand.u32 2147483647, %v818_v53  ;;  %vm824_vm13 = vweird.f32 %v818_v53 }
 0x7d3   :  { %v696_v54 = vsub.f32 1.0, %v695_v52  ;;  %1143 = vrcp.f32 %v1295_v18 }
 0x7d4   :  { %v831_v6 = vor.u32 1.1754944e-38, %v830_v2  ;;  %vm829_vm15 = vcmp.eq.f32.partialorder %v828_v3, 8.507059e+37 }
 0x7d5   :  { %v697_v56 = vmul.f32 %v1140_v4, %v696_v54  ;;  %v1111_v54 = vld [vmem:[%s1545_s5] ss:$0 sm:$0xff]  ;;  %s1296_s5 = smov [#allocation9]  }
 0x7d6   :  { %s1035_s6 = sshll.u32 %s1296_s5, 4  ;;  %s1036_s6 = int_to_ptr.vmem [resolvable:$true] %s1035_s6 }
 0x7d7   :  { %v698_v58 = vadd.f32 %v1140_v4, %v697_v56 }
 0x7d8   :  { %v1142_v59 = vpop.eup %1141 }
 0x7d9   :  { %v702_v61 = vsel %vm701_vm10, %v1140_v4, %v698_v58  ;;  %v820_v62 = vmul.f32 %v1142_v59, %v818_v53  ;;  %vm825_vm12 = vweird.f32 %v1142_v59  ;;  %v1144_v19 = vpop.eup %1143 }
 0x7da   :  { %v707_v63 = vsel %vm704_vm11, %v706_v60, %v702_v61  ;;  %vm826_vm14 = vmor %vm824_vm13, %vm825_vm12  ;;  %v545_v20 = vmul.f32 32.0, %v1144_v19  ;;  %vm549_vm2 = vweird.f32 %v1144_v19 }
 0x7db   :  { %v821_v0 = vsub.f32 1.0, %v820_v62  ;;  %v708_v1 = vmul.f32 %v1134_v35, %v707_v63 }
 0x7dc   :  { %v546_v21 = vsub.f32 1.0, %v545_v20 }
 0x7dd   :  { %v822_v7 = vmul.f32 %v1142_v59, %v821_v0  ;;  %1079 = vmatmul.msk.f32.vlgmr.msra.gmra.mxu1 %vm127_vm1, %v708_v1  ;;  %v709_v12 = vadd.f32 %v708_v1, %v1450_v9 }
 0x7de   :  { %v547_v22 = vmul.f32 %v1144_v19, %v546_v21 }
 0x7df   :  { %v823_v5 = vadd.f32 %v1142_v59, %v822_v7 }
 0x7e0   :  { %v548_v23 = vadd.f32 %v1144_v19, %v547_v22 }
 0x7e1   :  { %v827_v10 = vsel %vm826_vm14, %v1142_v59, %v823_v5 }
 0x7e2   :  { %v832_v11 = vsel %vm829_vm15, %v831_v6, %v827_v10  ;;  %v1501_v9 = vsel %vm549_vm2, %v1144_v19, %v548_v23 }
 0x7e3   :  { %v833_v13 = vmul.f32 %v1136_v38, %v832_v11 }
 0x7e4   :  { %v836_v14 = vpop.permute.xlu0 %835 }
 0x7e5   :  { %856 = vmatpush.msrb.mxu1 %v836_v14  ;;  %v834_v16 = vadd.f32 %v833_v13, %v709_v12 }
 0x7e6   :  { %938 = vrot.lane.b32.xlu1 %v1388_v17, %s1294_s30  ;;  %1084 = vmatmul.msk.f32.vlgmr.msrb.gmra.mxu1 %vm127_vm1, %v833_v13 }
 0x7e7   :  { %982 = vmatpush.msra.mxu1 %v1460_v15 }
 0x80f   :  { %v543_v25 = vpop.xlane.xlu0 %542 }
 0x810   :  { %v551_v26 = vmul.f32 %v1501_v9, %v543_v25 }
 0x812   :  { %v552_v28 = vsub.f32 %v1487_v46, %v551_v26 }
 0x814   :  { %v553_v17 = vmul.f32 %v552_v28, %v552_v28 }
 0x816   :  { %v554_v30 = vsel %vm87_vm0, %v553_v17, 0.0 }
 0x817   :  { %555 = vadd.xlane.f32.xlu1 %v554_v30 }
 0x840   :  { %v921_v15 = vpop.xlane.xlu1 %920 }
 0x841   :  { %1145 = vrcp.f32 %v921_v15  ;;  %v933_v35 = vand.u32 2147483648, %v921_v15  ;;  %v931_v37 = vand.u32 2147483647, %v921_v15  ;;  %vm927_vm4 = vweird.f32 %v921_v15 }
 0x843   :  { %v934_v39 = vor.u32 1.1754944e-38, %v933_v35  ;;  %vm932_vm6 = vcmp.eq.f32.partialorder %v931_v37, 8.507059e+37 }
 0x847   :  { %v1146_v31 = vpop.eup %1145 }
 0x848   :  { %v923_v29 = vmul.f32 %v1146_v31, %v921_v15  ;;  %vm928_vm3 = vweird.f32 %v1146_v31 }
 0x849   :  { %vm929_vm5 = vmor %vm927_vm4, %vm928_vm3 }
 0x84a   :  { %v924_v33 = vsub.f32 1.0, %v923_v29 }
 0x84c   :  { %v925_v36 = vmul.f32 %v1146_v31, %v924_v33 }
 0x84e   :  { %v926_v38 = vadd.f32 %v1146_v31, %v925_v36 }
 0x850   :  { %v930_v40 = vsel %vm929_vm5, %v1146_v31, %v926_v38 }
 0x851   :  { %v935_v41 = vsel %vm932_vm6, %v934_v39, %v930_v40 }
 0x852   :  { %v936_v42 = vmul.f32 %v1491_v50, %v935_v41 }
 0x854   :  { %v937_v43 = vadd.f32 %v936_v42, %v834_v16 }
 0x856   :  { %v988_v45 = vmul.f32 0.25, %v937_v43 }
 0x858   :  { %v939_v46 = vpop.permute.xlu1 %938  ;;  %990 = vst.msk [vmem:[#allocation9 + $0x8] sm:$0xff] %vm127_vm1, %v988_v45 }
 0x859   :  { %959 = vmatpush.msra.mxu2 %v939_v46  ;;  %1043 = dma.vmem_to_hbm [thread:$0]  %s1036_s6, 256, %s1038_s18, [#allocation10], %s1280_s13, %s1280_s13, %s1281_s14  }
 0x85a   :  { %v733_v47 = vpop.f32.mrf.mxu1  ;;  %1088 = vmatmul.msk.f32.vlgmr.msra.gmra.mxu2 %vm127_vm1, %v936_v42 }
 0x85b   :  { %1080 = vmatmul.msk.f32.vlgmr.msra.gmra.mxu3 %vm127_vm1, %v733_v47 }
 0x863   :  { %v858_v48 = vpop.f32.mrf.mxu1 }
 0x864   :  { %1085 = vmatmul.msk.f32.vlgmr.msrb.gmra.mxu3 %vm127_vm1, %v858_v48 }
 0x88a   :  { %v556_v27 = vpop.xlane.xlu1 %555 }
 0x88b   :  { %v557_v32 = vmul.f32 %v556_v27, %v1501_v9 }
 0x88d   :  { %v558_v34 = vadd.f32 1e-05, %v557_v32 }
 0x88f   :  { %1147 = vrsqrt.f32 %v558_v34  ;;  %vm565_vm8 = vweird.f32 %v558_v34 }
 0x895   :  { %v1148_v49 = vpop.eup %1147 }
 0x896   :  { %v560_v50 = vmul.f32 %v1148_v49, %v558_v34  ;;  %vm566_vm7 = vweird.f32 %v1148_v49 }
 0x897   :  { %vm567_vm9 = vmor %vm565_vm8, %vm566_vm7 }
 0x898   :  { %v561_v51 = vmul.f32 %v1148_v49, %v560_v50 }
 0x89a   :  { %v562_v4 = vmul.f32 0.5, %v561_v51 }
 0x89c   :  { %v563_v52 = vsub.f32 1.5, %v562_v4 }
 0x89e   :  { %v564_v53 = vmul.f32 %v1148_v49, %v563_v52 }
 0x8a0   :  { %v568_v55 = vsel %vm567_vm9, %v1148_v49, %v564_v53 }
 0x8a1   :  { %v569_v56 = vmul.f32 %v568_v55, %v552_v28 }
 0x8a3   :  { %v573_v58 = vmul.f32 %v1111_v54, %v569_v56 }
 0x8a5   :  { %v577_v59 = vadd.f32 %v1112_v57, %v573_v58 }
 0x8a7   :  { %578 = vst.msk [vmem:[#allocation8] sm:$0xff] %vm87_vm0, %v577_v59 }
 0x8dd   :  { %v961_v60 = vpop.f32.mrf.mxu2 }
 0x8de   :  { %1089 = vmatmul.msk.f32.vlgmr.msra.gmra.mxu1 %vm127_vm1, %v961_v60  ;;  %v756_v61 = vpop.f32.mrf.mxu3 }
 0x8df   :  { %v780_v63 = vadd.f32 %v1468_v24, %v756_v61 }
 0x8e7   :  { %v881_v62 = vpop.f32.mrf.mxu3 }
 0x8e8   :  { %v884_v0 = vadd.f32 %v881_v62, %v780_v63 }
 0x95b   :  { %v984_v1 = vpop.f32.mrf.mxu1 }
 0x95c   :  { %v987_v2 = vadd.f32 %v984_v1, %v884_v0 }
 0x95e   :  { %v991_v7 = vadd.f32 %v1483_v44, %v987_v2 }
 0x960   :  { %v992_v3 = vadd.f32 %v991_v7, %v1375_v8 }
 0x962   :  { %v993_v5 = vsel %vm87_vm0, %v992_v3, 0.0 }
 0x963   :  { %994 = vadd.xlane.f32.xlu2 %v993_v5 }
 0x9d6   :  { %v995_v6 = vpop.xlane.xlu2 %994 }
 0x9d7   :  { %v996_v10 = vmul.f32 %v995_v6, %v1501_v9 }
 0x9d9   :  { %v997_v11 = vsub.f32 %v992_v3, %v996_v10 }
 0x9db   :  { %v998_v12 = vmul.f32 %v997_v11, %v997_v11 }
 0x9dd   :  { %v999_v13 = vsel %vm87_vm0, %v998_v12, 0.0 }
 0x9de   :  { %1000 = vadd.xlane.f32.xlu0 %v999_v13 }
 0xa51   :  { %v1001_v8 = vpop.xlane.xlu0 %1000 }
 0xa52   :  { %v1002_v24 = vmul.f32 %v1001_v8, %v1501_v9 }
 0xa54   :  { %v1003_v44 = vadd.f32 1e-05, %v1002_v24 }
 0xa56   :  { %1149 = vrsqrt.f32 %v1003_v44  ;;  %vm1010_vm10 = vweird.f32 %v1003_v44 }
 0xa5c   :  { %v1150_v14 = vpop.eup %1149 }
 0xa5d   :  { %v1005_v16 = vmul.f32 %v1150_v14, %v1003_v44  ;;  %vm1011_vm1 = vweird.f32 %v1150_v14 }
 0xa5e   :  { %vm1012_vm11 = vmor %vm1010_vm10, %vm1011_vm1 }
 0xa5f   :  { %v1006_v18 = vmul.f32 %v1150_v14, %v1005_v16 }
 0xa61   :  { %v1007_v19 = vmul.f32 0.5, %v1006_v18 }
 0xa63   :  { %v1008_v20 = vsub.f32 1.5, %v1007_v19 }
 0xa65   :  { %v1009_v21 = vmul.f32 %v1150_v14, %v1008_v20 }
 0xa67   :  { %v1013_v22 = vsel %vm1012_vm11, %v1150_v14, %v1009_v21 }
 0xa68   :  { %v1014_v23 = vmul.f32 %v1013_v22, %v997_v11 }
 0xa6a   :  { %v1015_v9 = vmul.f32 %v1111_v54, %v1014_v23 }
 0xa6c   :  { %v1016_v25 = vadd.f32 %v1112_v57, %v1015_v9 }
 0xa6e   :  { %1017 = vst.msk [vmem:[#allocation8 + $0x8] sm:$0xff] %vm87_vm0, %v1016_v25 }
 0xa6f   :  { %1030 = dma.vmem_to_hbm [thread:$0]  %s1023_s1, 256, %s1025_s3, [#allocation4], %s1280_s13, %s1280_s13, %s1281_s14  }
 0xa70   :  { %1275 = dma.done.wait [#allocation4], 256  }
 0xa71   :  { %1276 = vsyncadd [#allocation4], 4294967040 }
 0xa72   :  { %1277 = dma.done.wait [#allocation10], 256  }
 0xa73   :  { %1278 = vsyncadd [#allocation10], 4294967040 }
 0xa74   :  { %1052 = vsyncpa [#allocation3], 1 }
 0xa75   :  { %1053 = vsyncpa [#allocation6], 1 }
 0xa76   :  { %1054 = vsyncpa [#allocation4], 1 }
 0xa77   :  { %1055 = vsyncpa [#allocation10], 1 }

</bundles_post_ra>
